<compile_context>
chip_gen: v7x
topology: tpu7x:2x2x1
jax: 0.10.0
libtpu: 0.0.40
codegen_flags: <defaults>
</compile_context>

<pallas_src>
import functools
import math

import jax
import jax.numpy as jnp
from jax.experimental import pallas as pl
from jax.experimental.pallas import tpu as pltpu

# Storage / MXU-operand dtype for activations & matmul weights (cast once in the
# wrapper, never per-op inside kernels).  Set to jnp.float32 for exact-f32
# parity checks against the PyTorch reference.
ACT_DTYPE = jnp.bfloat16


def _round_up(x, m):
    return ((x + m - 1) // m) * m


def _vmem_limit(est_bytes):
    """Per-call scoped-VMEM budget derived from actual block/scratch sizes."""
    cap = 48 * 1024 * 1024
    try:  # shrink further on small-VMEM parts (v7x: 64 MiB physical per core)
        cap = min(cap, (int(pltpu.get_tpu_info().vmem_capacity_bytes) * 3) // 4)
    except Exception:
        pass
    return int(min(cap, max(32 * 1024 * 1024, int(est_bytes) + (8 << 20))))


def _cparams(dim_sem=None, est_bytes=0):
    kw = dict(vmem_limit_bytes=_vmem_limit(est_bytes))
    if dim_sem is not None:
        kw["dimension_semantics"] = dim_sem
    return pltpu.CompilerParams(**kw)


# ---------------------------------------------------------------------------
# 1) Fused projector + kernel_size>1 TDNN layers (per-batch, all-VMEM chain).
#    The unfold is fused into the matmul: each layer accumulates kernel_size
#    time-shifted partial matmuls, tiled over time so accumulators stay small.
# ---------------------------------------------------------------------------

def _proj_tdnn_kernel(*refs, n_head, kernels, dilations, t_in, t_final,
                      t_alloc, tile_t):
    x_ref = refs[0]
    pw_ref = refs[1]
    pb_ref = refs[2]
    o_ref = refs[3 + 2 * n_head]
    bufs = refs[4 + 2 * n_head:]          # 0, 1 or 2 bf16 ping-pong buffers

    c0 = pw_ref.shape[1]
    pw = pw_ref[...]                      # resident bf16 projector weight
    pb = pb_ref[...]                      # f32 bias

    # ---- projector: (T, H) @ (H, c0) + b (no activation), time-tiled ------
    for t0 in range(0, t_in, tile_t):
        tt = min(tile_t, t_in - t0)
        h = jnp.dot(x_ref[0, t0:t0 + tt, :], pw,
                    preferred_element_type=jnp.float32) + pb
        if n_head == 0:
            o_ref[0, t0:t0 + tt, :] = h.astype(o_ref.dtype)
        else:
            bufs[0][t0:t0 + tt, :c0] = h.astype(bufs[0].dtype)

    # ---- kernel_size>1 TDNN layers: unfold fused into K partial matmuls ---
    t_cur = t_in
    c_in = c0
    cur = 0
    for li in range(n_head):
        ksz = kernels[li]
        dil = dilations[li]
        w_ref = refs[3 + 2 * li]
        b_ref = refs[4 + 2 * li]
        c_out = w_ref.shape[1]
        t_out = t_cur - dil * (ksz - 1)
        last = li == n_head - 1
        bias = b_ref[...]
        src = bufs[cur]
        for t0 in range(0, t_out, tile_t):
            tt = min(tile_t, t_out - t0)
            acc = jnp.dot(src[t0:t0 + tt, :c_in], w_ref[0:c_in, :],
                          preferred_element_type=jnp.float32)
            for j in range(1, ksz):
                acc = acc + jnp.dot(
                    src[t0 + j * dil:t0 + j * dil + tt, :c_in],
                    w_ref[j * c_in:(j + 1) * c_in, :],
                    preferred_element_type=jnp.float32)
            y = jnp.maximum(acc + bias, 0.0)        # f32 elementwise
            if last:
                o_ref[0, t0:t0 + tt, :] = y.astype(o_ref.dtype)
            else:
                dst = bufs[1 - cur]
                dst[t0:t0 + tt, :c_out] = y.astype(dst.dtype)
        if not last:
            cur = 1 - cur
            c_in = c_out
        t_cur = t_out

    # zero the (t_alloc - t_final) pad rows so downstream never sees garbage
    if t_alloc > t_final:
        o_ref[0, t_final:t_alloc, :] = jnp.zeros(
            (t_alloc - t_final, o_ref.shape[-1]), o_ref.dtype)


def fused_projector_tdnn(x, proj_w, proj_b, head_ws, head_bs, kernels,
                         dilations, t_final, t_alloc, tile_t=256):
    B, T, H = x.shape
    c0 = proj_w.shape[1]
    n_head = len(head_ws)
    c_last = head_ws[-1].shape[1] if n_head else c0
    n_buf = 0 if n_head == 0 else (1 if n_head == 1 else 2)
    c_buf = max([c0] + [w.shape[1] for w in head_ws[:-1]]) if n_head else c0

    in_specs = [pl.BlockSpec((1, T, H), lambda b: (b, 0, 0)),
                pl.BlockSpec((H, c0), lambda b: (0, 0)),     # resident weight
                pl.BlockSpec((1, c0), lambda b: (0, 0))]
    args = [x, proj_w, proj_b.reshape(1, c0)]
    for w, bia in zip(head_ws, head_bs):
        cw = w.shape[1]
        in_specs.append(pl.BlockSpec(w.shape, lambda b: (0, 0)))
        in_specs.append(pl.BlockSpec((1, cw), lambda b: (0, 0)))
        args.append(w)
        args.append(bia.reshape(1, cw))

    scratch = [pltpu.VMEM((T, c_buf), ACT_DTYPE) for _ in range(n_buf)]

    isz = jnp.dtype(ACT_DTYPE).itemsize
    c_widest = max([c0] + [w.shape[1] for w in head_ws])
    est = (2 * T * H * isz
           + 2 * sum(int(a.size) * a.dtype.itemsize for a in args[1:])
           + 2 * t_alloc * c_last * isz
           + n_buf * T * c_buf * isz
           + 6 * tile_t * c_widest * 4)

    # TODO(synk): on v7x (2 TCs, 64 MiB VMEM) a batch-only parallel grid
    # under-utilizes megacore for B<=2; a halo-aware time-tile grid axis
    # would improve that case.
    return pl.pallas_call(
        functools.partial(_proj_tdnn_kernel, n_head=n_head,
                          kernels=tuple(kernels), dilations=tuple(dilations),
                          t_in=T, t_final=t_final, t_alloc=t_alloc,
                          tile_t=tile_t),
        out_shape=jax.ShapeDtypeStruct((B, t_alloc, c_last), ACT_DTYPE),
        grid=(B,),
        in_specs=in_specs,
        out_specs=pl.BlockSpec((1, t_alloc, c_last), lambda b: (b, 0, 0)),
        scratch_shapes=scratch,
        compiler_params=_cparams(("parallel",), est),
    )(*args)


# ---------------------------------------------------------------------------
# 2) Fused tail: trailing kernel_size==1 TDNN layers (dense+ReLU) + statistic
#    pooling, streamed over time tiles with sum / sum-of-squares VMEM scratch.
# ---------------------------------------------------------------------------

def _tail_kernel(*refs, n_tail, t_valid, tile_t, need_mask):
    x_ref = refs[0]
    o_ref = refs[1 + 2 * n_tail]
    s_ref = refs[2 + 2 * n_tail]
    ss_ref = refs[3 + 2 * n_tail]
    ti = pl.program_id(1)

    @pl.when(ti == 0)
    def _():
        s_ref[...] = jnp.zeros_like(s_ref)
        ss_ref[...] = jnp.zeros_like(ss_ref)

    h = x_ref[0]                                     # (tile_t, c_in) ACT_DTYPE
    for li in range(n_tail):                         # fused dense + ReLU
        w_ref = refs[1 + 2 * li]
        b_ref = refs[2 + 2 * li]
        h = jnp.dot(h.astype(ACT_DTYPE), w_ref[...],
                    preferred_element_type=jnp.float32)
        h = jnp.maximum(h + b_ref[...], 0.0)         # f32 elementwise
    h = h.astype(jnp.float32)

    if need_mask:                                    # zero rows past valid T
        row = jax.lax.broadcasted_iota(jnp.int32, (tile_t, 1), 0) + ti * tile_t
        h = jnp.where(row < t_valid, h, 0.0)

    s_ref[...] += jnp.sum(h, axis=0, keepdims=True)
    ss_ref[...] += jnp.sum(h * h, axis=0, keepdims=True)

    @pl.when(ti == pl.num_programs(1) - 1)
    def _():
        # TODO(synk): sum / sum-of-squares can cancel for very long T; a
        # two-pass or Welford update would track torch.std more closely.
        denom = max(t_valid - 1, 1)                  # unbiased std, T==1 safe
        mean = s_ref[...] * (1.0 / t_valid)
        var = (ss_ref[...] - t_valid * mean * mean) * (1.0 / denom)
        std = jnp.sqrt(jnp.maximum(var, 0.0))
        o_ref[0] = jnp.concatenate([mean, std], axis=0)


def tail_stat_pool(x, tail_ws, tail_bs, t_valid, tile_t):
    B, Ta, c_in = x.shape
    n_tail = len(tail_ws)
    if n_tail:
        c_last = tail_ws[-1].shape[1]
        c_pad = _round_up(c_last, 128)               # lane-dense scratch/stores
        if c_pad != c_last:
            tail_ws = list(tail_ws[:-1]) + [
                jnp.pad(tail_ws[-1], ((0, 0), (0, c_pad - c_last)))]
            tail_bs = list(tail_bs[:-1]) + [
                jnp.pad(tail_bs[-1], ((0, c_pad - c_last),))]
    else:
        c_last = c_pad = c_in

    tt = tile_t
    assert Ta % tt == 0
    need_mask = Ta > t_valid

    in_specs = [pl.BlockSpec((1, tt, c_in), lambda b, i: (b, i, 0))]
    args = [x]
    for w, bia in zip(tail_ws, tail_bs):
        cw = w.shape[1]
        in_specs.append(pl.BlockSpec(w.shape, lambda b, i: (0, 0)))
        in_specs.append(pl.BlockSpec((1, cw), lambda b, i: (0, 0)))
        args.append(w)
        args.append(bia.reshape(1, cw))

    est = (2 * tt * c_in * jnp.dtype(ACT_DTYPE).itemsize
           + 2 * sum(int(a.size) * a.dtype.itemsize for a in args[1:])
           + 2 * 2 * c_pad * 4 + 2 * c_pad * 4
           + 6 * tt * c_pad * 4)

    out = pl.pallas_call(
        functools.partial(_tail_kernel, n_tail=n_tail, t_valid=t_valid,
                          tile_t=tt, need_mask=need_mask),
        out_shape=jax.ShapeDtypeStruct((B, 2, c_pad), jnp.float32),
        grid=(B, Ta // tt),
        in_specs=in_specs,
        out_specs=pl.BlockSpec((1, 2, c_pad), lambda b, i: (b, 0, 0)),
        scratch_shapes=[pltpu.VMEM((1, c_pad), jnp.float32),
                        pltpu.VMEM((1, c_pad), jnp.float32)],
        compiler_params=_cparams(("parallel", "arbitrary"), est),
    )(*args)
    return out[:, :, :c_last].reshape(B, 2 * c_last)     # [mean | std]


# ---------------------------------------------------------------------------
# 3) features = Linear + BatchNorm1d (gamma frozen at 1.0).  training=True uses
#    batch statistics (nn.Module default); training=False uses running stats.
#    Tiny -> single-block f32 kernel.
# ---------------------------------------------------------------------------

def _features_kernel(x_ref, w_ref, b_ref, g_ref, beta_ref, rm_ref, rv_ref,
                     o_ref, *, eps, training):
    h = jnp.dot(x_ref[...], w_ref[...], preferred_element_type=jnp.float32)
    h = h + b_ref[...]
    if training:
        mu = jnp.mean(h, axis=0, keepdims=True)
        var = jnp.mean((h - mu) * (h - mu), axis=0, keepdims=True)  # biased (BN)
    else:
        mu = rm_ref[...]
        var = rv_ref[...]
    y = g_ref[...] * (h - mu) * jax.lax.rsqrt(var + eps) + beta_ref[...]
    o_ref[...] = y.astype(o_ref.dtype)


def features_head(stats, w, b, gamma, beta, running_mean, running_var,
                  eps=1e-5, training=True):
    # TODO(synk): training-mode BN does not update running stats (forward only).
    B, K = stats.shape
    F = w.shape[1]

    def fs(shape):
        return pl.BlockSpec(shape, lambda: (0,) * len(shape))

    est = (B * K + K * F + 5 * F + B * F) * 4
    return pl.pallas_call(
        functools.partial(_features_kernel, eps=eps, training=training),
        out_shape=jax.ShapeDtypeStruct((B, F), jnp.float32),
        in_specs=[fs((B, K)), fs((K, F)), fs((1, F)), fs((1, F)), fs((1, F)),
                  fs((1, F)), fs((1, F))],
        out_specs=fs((B, F)),
        compiler_params=_cparams(None, est),
    )(stats, w, b.reshape(1, F), gamma.reshape(1, F), beta.reshape(1, F),
      running_mean.reshape(1, F), running_var.reshape(1, F))


# ---------------------------------------------------------------------------
# Forward pass
# ---------------------------------------------------------------------------

def xvector_forward(hidden_states, params, tdnn_kernel, tdnn_dilation,
                    training=True, tile_t_head=256, tile_t_tail=512):
    B, T, H = hidden_states.shape
    n_layers = len(tdnn_kernel)

    # trailing kernel_size==1 layers are plain dense+ReLU -> fuse into pooling
    n_tail = 0
    while n_tail < n_layers and tdnn_kernel[n_layers - 1 - n_tail] == 1:
        n_tail += 1
    n_head = n_layers - n_tail

    # one-time bf16 casts of matmul operands (wrapper side, never per-op)
    x = hidden_states.astype(ACT_DTYPE)
    proj_w = params["proj_w"].astype(ACT_DTYPE)
    head_ws = [params["tdnn_w"][i].astype(ACT_DTYPE) for i in range(n_head)]
    head_bs = [params["tdnn_b"][i] for i in range(n_head)]
    tail_ws = [params["tdnn_w"][i].astype(ACT_DTYPE)
               for i in range(n_head, n_layers)]
    tail_bs = [params["tdnn_b"][i] for i in range(n_head, n_layers)]

    t_final = T
    for i in range(n_head):
        t_final -= tdnn_dilation[i] * (tdnn_kernel[i] - 1)
    assert t_final >= 1, "sequence too short for the TDNN receptive field"

    # tail time tile; the fused head kernel pads its output allocation up to a
    # multiple of it (pad rows zeroed in VMEM, masked in pooling) so no
    # wrapper-side jnp.pad and no ragged blocks are needed anywhere.
    tt_tail = min(tile_t_tail, _round_up(t_final, 8))
    t_alloc = _round_up(t_final, tt_tail)

    act = fused_projector_tdnn(x, proj_w, params["proj_b"], head_ws, head_bs,
                               tdnn_kernel[:n_head], tdnn_dilation[:n_head],
                               t_final=t_final, t_alloc=t_alloc,
                               tile_t=tile_t_head)

    stats = tail_stat_pool(act, tail_ws, tail_bs, t_valid=t_final,
                           tile_t=tt_tail)

    return features_head(stats, params["feat_w"], params["feat_b"],
                         params["bn_gamma"], params["bn_beta"],
                         params["bn_mean"], params["bn_var"],
                         training=training)


# ---------------------------------------------------------------------------
# Deterministic parameter init (xavier-uniform weights, zero biases) matching
# WavLMForXVector._init_weights for the head.  Parameters are stored f32
# (source of truth); the forward wrapper casts matmul operands to bf16 once.
# ---------------------------------------------------------------------------

def _xavier(key, fan_in, fan_out):
    a = math.sqrt(6.0 / (fan_in + fan_out))
    return jax.random.uniform(key, (fan_in, fan_out), jnp.float32, -a, a)


def init_params(key, hidden_size, tdnn_dim, tdnn_kernel, feature_dim):
    keys = jax.random.split(key, 2 + len(tdnn_dim))
    params = {
        "proj_w": _xavier(keys[0], hidden_size, tdnn_dim[0]),
        "proj_b": jnp.zeros((tdnn_dim[0],), jnp.float32),
        "tdnn_w": [],
        "tdnn_b": [],
    }
    for i in range(len(tdnn_dim)):
        in_dim = tdnn_dim[i - 1] if i > 0 else tdnn_dim[0]
        params["tdnn_w"].append(
            _xavier(keys[1 + i], in_dim * tdnn_kernel[i], tdnn_dim[i]))
        params["tdnn_b"].append(jnp.zeros((tdnn_dim[i],), jnp.float32))
    params["feat_w"] = _xavier(keys[-1], tdnn_dim[-1] * 2, feature_dim)
    params["feat_b"] = jnp.zeros((feature_dim,), jnp.float32)
    params["bn_gamma"] = jnp.ones((feature_dim,), jnp.float32)   # frozen at 1.0
    params["bn_beta"] = jnp.zeros((feature_dim,), jnp.float32)
    params["bn_mean"] = jnp.zeros((feature_dim,), jnp.float32)   # running stats
    params["bn_var"] = jnp.ones((feature_dim,), jnp.float32)
    return params


# ---------------------------------------------------------------------------

if __name__ == "__main__":
    # small shapes consistent with the module structure
    B, T = 2, 32
    hidden_size = 32
    tdnn_dim = (16, 16, 16, 16, 16)
    tdnn_kernel = (5, 3, 3, 1, 1)
    tdnn_dilation = (1, 2, 3, 1, 1)
    feature_dim = 8

    root = jax.random.PRNGKey(0)
    k_in, k_par = jax.random.split(root)

    # stand-in for the wavlm last hidden state: (B, T, hidden_size)
    hidden_states = jax.random.normal(k_in, (B, T, hidden_size), jnp.float32)
    params = init_params(k_par, hidden_size, tdnn_dim, tdnn_kernel, feature_dim)

    out = xvector_forward(hidden_states, params, tdnn_kernel, tdnn_dilation)
    out = jax.block_until_ready(out)

    assert out.shape == (B, feature_dim), out.shape
    assert jnp.all(jnp.isfinite(out))
    print("KERNEL_OK")
</pallas_src>

<mosaic_0001>
module attributes {stable_mosaic.version = 11 : i64} {
  func.func @_proj_tdnn_kernel(%arg0: i32, %arg1: memref<1x32x32xbf16, #tpu.memory_space<vmem>>, %arg2: memref<32x16xbf16, #tpu.memory_space<vmem>>, %arg3: memref<1x16xf32, #tpu.memory_space<vmem>>, %arg4: memref<80x16xbf16, #tpu.memory_space<vmem>>, %arg5: memref<1x16xf32, #tpu.memory_space<vmem>>, %arg6: memref<48x16xbf16, #tpu.memory_space<vmem>>, %arg7: memref<1x16xf32, #tpu.memory_space<vmem>>, %arg8: memref<48x16xbf16, #tpu.memory_space<vmem>>, %arg9: memref<1x16xf32, #tpu.memory_space<vmem>>, %arg10: memref<1x24x16xbf16, #tpu.memory_space<vmem>>, %arg11: memref<32x16xbf16, #tpu.memory_space<vmem>>, %arg12: memref<32x16xbf16, #tpu.memory_space<vmem>>) attributes {dimension_semantics = [#tpu.dimension_semantics<parallel>], iteration_bounds = array<i64: 2>, scalar_prefetch = 0 : i64, scratch_operands = 2 : i64, tpu.core_type = #tpu.core_type<tc>, window_params = [{transform_indices = @transform_0, window_bounds = array<i64: 1, 32, 32>}, {pipeline_mode = #tpu.pipeline_mode<synchronous>, transform_indices = @transform_1, window_bounds = array<i64: 32, 16>}, {pipeline_mode = #tpu.pipeline_mode<synchronous>, transform_indices = @transform_2, window_bounds = array<i64: 1, 16>}, {pipeline_mode = #tpu.pipeline_mode<synchronous>, transform_indices = @transform_3, window_bounds = array<i64: 80, 16>}, {pipeline_mode = #tpu.pipeline_mode<synchronous>, transform_indices = @transform_4, window_bounds = array<i64: 1, 16>}, {pipeline_mode = #tpu.pipeline_mode<synchronous>, transform_indices = @transform_5, window_bounds = array<i64: 48, 16>}, {pipeline_mode = #tpu.pipeline_mode<synchronous>, transform_indices = @transform_6, window_bounds = array<i64: 1, 16>}, {pipeline_mode = #tpu.pipeline_mode<synchronous>, transform_indices = @transform_7, window_bounds = array<i64: 48, 16>}, {pipeline_mode = #tpu.pipeline_mode<synchronous>, transform_indices = @transform_8, window_bounds = array<i64: 1, 16>}, {transform_indices = @transform_9, window_bounds = array<i64: 1, 24, 16>}]} {
    %c0 = arith.constant 0 : index
    %c0_0 = arith.constant 0 : index
    %0 = vector.load %arg2[%c0, %c0_0] : memref<32x16xbf16, #tpu.memory_space<vmem>>, vector<32x16xbf16>
    %c0_1 = arith.constant 0 : index
    %c0_2 = arith.constant 0 : index
    %1 = vector.load %arg3[%c0_1, %c0_2] : memref<1x16xf32, #tpu.memory_space<vmem>>, vector<1x16xf32>
    %c0_3 = arith.constant 0 : index
    %c0_4 = arith.constant 0 : index
    %c0_5 = arith.constant 0 : index
    %2 = vector.load %arg1[%c0_3, %c0_4, %c0_5] : memref<1x32x32xbf16, #tpu.memory_space<vmem>>, vector<1x32x32xbf16>
    %3 = vector.shape_cast %2 : vector<1x32x32xbf16> to vector<32x32xbf16>
    %cst = arith.constant dense<0.000000e+00> : vector<32x16xf32>
    %4 = tpu.matmul %3, %0, %cst {dimension_numbers = #tpu.dot_dimension_numbers<[1], [0], [0], [1], [0, 0, 1, 1], [], []>} : vector<32x32xbf16>, vector<32x16xbf16>, vector<32x16xf32> -> vector<32x16xf32>
    %5 = vector.broadcast %1 : vector<1x16xf32> to vector<32x16xf32>
    %6 = arith.addf %4, %5 : vector<32x16xf32>
    %7 = arith.truncf %6 : vector<32x16xf32> to vector<32x16xbf16>
    %c0_6 = arith.constant 0 : index
    %c0_7 = arith.constant 0 : index
    %8 = vector.load %arg11[%c0_6, %c0_7] : memref<32x16xbf16, #tpu.memory_space<vmem>>, vector<32x16xbf16>
    tpu.vector_store %arg11[%c0_6, %c0_7], %7 {strides = array<i32>} : memref<32x16xbf16, #tpu.memory_space<vmem>>, vector<32x16xbf16>,
    %c0_8 = arith.constant 0 : index
    %c0_9 = arith.constant 0 : index
    %9 = vector.load %arg5[%c0_8, %c0_9] : memref<1x16xf32, #tpu.memory_space<vmem>>, vector<1x16xf32>
    %c0_10 = arith.constant 0 : index
    %c0_11 = arith.constant 0 : index
    %10 = vector.load %arg11[%c0_10, %c0_11] : memref<32x16xbf16, #tpu.memory_space<vmem>>, vector<28x16xbf16>
    %c0_12 = arith.constant 0 : index
    %c0_13 = arith.constant 0 : index
    %11 = vector.load %arg4[%c0_12, %c0_13] : memref<80x16xbf16, #tpu.memory_space<vmem>>, vector<16x16xbf16>
    %cst_14 = arith.constant dense<0.000000e+00> : vector<28x16xf32>
    %12 = tpu.matmul %10, %11, %cst_14 {dimension_numbers = #tpu.dot_dimension_numbers<[1], [0], [0], [1], [0, 0, 1, 1], [], []>} : vector<28x16xbf16>, vector<16x16xbf16>, vector<28x16xf32> -> vector<28x16xf32>
    %c1 = arith.constant 1 : index
    %c0_15 = arith.constant 0 : index
    %13 = vector.load %arg11[%c1, %c0_15] : memref<32x16xbf16, #tpu.memory_space<vmem>>, vector<28x16xbf16>
    %c16 = arith.constant 16 : index
    %c0_16 = arith.constant 0 : index
    %14 = vector.load %arg4[%c16, %c0_16] : memref<80x16xbf16, #tpu.memory_space<vmem>>, vector<16x16xbf16>
    %cst_17 = arith.constant dense<0.000000e+00> : vector<28x16xf32>
    %15 = tpu.matmul %13, %14, %cst_17 {dimension_numbers = #tpu.dot_dimension_numbers<[1], [0], [0], [1], [0, 0, 1, 1], [], []>} : vector<28x16xbf16>, vector<16x16xbf16>, vector<28x16xf32> -> vector<28x16xf32>
    %16 = arith.addf %12, %15 : vector<28x16xf32>
    %c2 = arith.constant 2 : index
    %c0_18 = arith.constant 0 : index
    %17 = vector.load %arg11[%c2, %c0_18] : memref<32x16xbf16, #tpu.memory_space<vmem>>, vector<28x16xbf16>
    %c32 = arith.constant 32 : index
    %c0_19 = arith.constant 0 : index
    %18 = vector.load %arg4[%c32, %c0_19] : memref<80x16xbf16, #tpu.memory_space<vmem>>, vector<16x16xbf16>
    %cst_20 = arith.constant dense<0.000000e+00> : vector<28x16xf32>
    %19 = tpu.matmul %17, %18, %cst_20 {dimension_numbers = #tpu.dot_dimension_numbers<[1], [0], [0], [1], [0, 0, 1, 1], [], []>} : vector<28x16xbf16>, vector<16x16xbf16>, vector<28x16xf32> -> vector<28x16xf32>
    %20 = arith.addf %16, %19 : vector<28x16xf32>
    %c3 = arith.constant 3 : index
    %c0_21 = arith.constant 0 : index
    %21 = vector.load %arg11[%c3, %c0_21] : memref<32x16xbf16, #tpu.memory_space<vmem>>, vector<28x16xbf16>
    %c48 = arith.constant 48 : index
    %c0_22 = arith.constant 0 : index
    %22 = vector.load %arg4[%c48, %c0_22] : memref<80x16xbf16, #tpu.memory_space<vmem>>, vector<16x16xbf16>
    %cst_23 = arith.constant dense<0.000000e+00> : vector<28x16xf32>
    %23 = tpu.matmul %21, %22, %cst_23 {dimension_numbers = #tpu.dot_dimension_numbers<[1], [0], [0], [1], [0, 0, 1, 1], [], []>} : vector<28x16xbf16>, vector<16x16xbf16>, vector<28x16xf32> -> vector<28x16xf32>
    %24 = arith.addf %20, %23 : vector<28x16xf32>
    %c4 = arith.constant 4 : index
    %c0_24 = arith.constant 0 : index
    %25 = vector.load %arg11[%c4, %c0_24] : memref<32x16xbf16, #tpu.memory_space<vmem>>, vector<28x16xbf16>
    %c64 = arith.constant 64 : index
    %c0_25 = arith.constant 0 : index
    %26 = vector.load %arg4[%c64, %c0_25] : memref<80x16xbf16, #tpu.memory_space<vmem>>, vector<16x16xbf16>
    %cst_26 = arith.constant dense<0.000000e+00> : vector<28x16xf32>
    %27 = tpu.matmul %25, %26, %cst_26 {dimension_numbers = #tpu.dot_dimension_numbers<[1], [0], [0], [1], [0, 0, 1, 1], [], []>} : vector<28x16xbf16>, vector<16x16xbf16>, vector<28x16xf32> -> vector<28x16xf32>
    %28 = arith.addf %24, %27 : vector<28x16xf32>
    %29 = vector.broadcast %9 : vector<1x16xf32> to vector<28x16xf32>
    %30 = arith.addf %28, %29 : vector<28x16xf32>
    %cst_27 = arith.constant 0.000000e+00 : f32
    %31 = vector.broadcast %cst_27 : f32 to vector<28x16xf32>
    %32 = arith.maximumf %30, %31 : vector<28x16xf32>
    %33 = arith.truncf %32 : vector<28x16xf32> to vector<28x16xbf16>
    %c0_28 = arith.constant 0 : index
    %c0_29 = arith.constant 0 : index
    %34 = vector.load %arg12[%c0_28, %c0_29] : memref<32x16xbf16, #tpu.memory_space<vmem>>, vector<28x16xbf16>
    tpu.vector_store %arg12[%c0_28, %c0_29], %33 {strides = array<i32>} : memref<32x16xbf16, #tpu.memory_space<vmem>>, vector<28x16xbf16>,
    %c0_30 = arith.constant 0 : index
    %c0_31 = arith.constant 0 : index
    %35 = vector.load %arg7[%c0_30, %c0_31] : memref<1x16xf32, #tpu.memory_space<vmem>>, vector<1x16xf32>
    %c0_32 = arith.constant 0 : index
    %c0_33 = arith.constant 0 : index
    %36 = vector.load %arg12[%c0_32, %c0_33] : memref<32x16xbf16, #tpu.memory_space<vmem>>, vector<24x16xbf16>
    %c0_34 = arith.constant 0 : index
    %c0_35 = arith.constant 0 : index
    %37 = vector.load %arg6[%c0_34, %c0_35] : memref<48x16xbf16, #tpu.memory_space<vmem>>, vector<16x16xbf16>
    %cst_36 = arith.constant dense<0.000000e+00> : vector<24x16xf32>
    %38 = tpu.matmul %36, %37, %cst_36 {dimension_numbers = #tpu.dot_dimension_numbers<[1], [0], [0], [1], [0, 0, 1, 1], [], []>} : vector<24x16xbf16>, vector<16x16xbf16>, vector<24x16xf32> -> vector<24x16xf32>
    %c2_37 = arith.constant 2 : index
    %c0_38 = arith.constant 0 : index
    %39 = vector.load %arg12[%c2_37, %c0_38] : memref<32x16xbf16, #tpu.memory_space<vmem>>, vector<24x16xbf16>
    %c16_39 = arith.constant 16 : index
    %c0_40 = arith.constant 0 : index
    %40 = vector.load %arg6[%c16_39, %c0_40] : memref<48x16xbf16, #tpu.memory_space<vmem>>, vector<16x16xbf16>
    %cst_41 = arith.constant dense<0.000000e+00> : vector<24x16xf32>
    %41 = tpu.matmul %39, %40, %cst_41 {dimension_numbers = #tpu.dot_dimension_numbers<[1], [0], [0], [1], [0, 0, 1, 1], [], []>} : vector<24x16xbf16>, vector<16x16xbf16>, vector<24x16xf32> -> vector<24x16xf32>
    %42 = arith.addf %38, %41 : vector<24x16xf32>
    %c4_42 = arith.constant 4 : index
    %c0_43 = arith.constant 0 : index
    %43 = vector.load %arg12[%c4_42, %c0_43] : memref<32x16xbf16, #tpu.memory_space<vmem>>, vector<24x16xbf16>
    %c32_44 = arith.constant 32 : index
    %c0_45 = arith.constant 0 : index
    %44 = vector.load %arg6[%c32_44, %c0_45] : memref<48x16xbf16, #tpu.memory_space<vmem>>, vector<16x16xbf16>
    %cst_46 = arith.constant dense<0.000000e+00> : vector<24x16xf32>
    %45 = tpu.matmul %43, %44, %cst_46 {dimension_numbers = #tpu.dot_dimension_numbers<[1], [0], [0], [1], [0, 0, 1, 1], [], []>} : vector<24x16xbf16>, vector<16x16xbf16>, vector<24x16xf32> -> vector<24x16xf32>
    %46 = arith.addf %42, %45 : vector<24x16xf32>
    %47 = vector.broadcast %35 : vector<1x16xf32> to vector<24x16xf32>
    %48 = arith.addf %46, %47 : vector<24x16xf32>
    %cst_47 = arith.constant 0.000000e+00 : f32
    %49 = vector.broadcast %cst_47 : f32 to vector<24x16xf32>
    %50 = arith.maximumf %48, %49 : vector<24x16xf32>
    %51 = arith.truncf %50 : vector<24x16xf32> to vector<24x16xbf16>
    %c0_48 = arith.constant 0 : index
    %c0_49 = arith.constant 0 : index
    %52 = vector.load %arg11[%c0_48, %c0_49] : memref<32x16xbf16, #tpu.memory_space<vmem>>, vector<24x16xbf16>
    tpu.vector_store %arg11[%c0_48, %c0_49], %51 {strides = array<i32>} : memref<32x16xbf16, #tpu.memory_space<vmem>>, vector<24x16xbf16>,
    %c0_50 = arith.constant 0 : index
    %c0_51 = arith.constant 0 : index
    %53 = vector.load %arg9[%c0_50, %c0_51] : memref<1x16xf32, #tpu.memory_space<vmem>>, vector<1x16xf32>
    %c0_52 = arith.constant 0 : index
    %c0_53 = arith.constant 0 : index
    %54 = vector.load %arg11[%c0_52, %c0_53] : memref<32x16xbf16, #tpu.memory_space<vmem>>, vector<18x16xbf16>
    %c0_54 = arith.constant 0 : index
    %c0_55 = arith.constant 0 : index
    %55 = vector.load %arg8[%c0_54, %c0_55] : memref<48x16xbf16, #tpu.memory_space<vmem>>, vector<16x16xbf16>
    %cst_56 = arith.constant dense<0.000000e+00> : vector<18x16xf32>
    %56 = tpu.matmul %54, %55, %cst_56 {dimension_numbers = #tpu.dot_dimension_numbers<[1], [0], [0], [1], [0, 0, 1, 1], [], []>} : vector<18x16xbf16>, vector<16x16xbf16>, vector<18x16xf32> -> vector<18x16xf32>
    %c3_57 = arith.constant 3 : index
    %c0_58 = arith.constant 0 : index
    %57 = vector.load %arg11[%c3_57, %c0_58] : memref<32x16xbf16, #tpu.memory_space<vmem>>, vector<18x16xbf16>
    %c16_59 = arith.constant 16 : index
    %c0_60 = arith.constant 0 : index
    %58 = vector.load %arg8[%c16_59, %c0_60] : memref<48x16xbf16, #tpu.memory_space<vmem>>, vector<16x16xbf16>
    %cst_61 = arith.constant dense<0.000000e+00> : vector<18x16xf32>
    %59 = tpu.matmul %57, %58, %cst_61 {dimension_numbers = #tpu.dot_dimension_numbers<[1], [0], [0], [1], [0, 0, 1, 1], [], []>} : vector<18x16xbf16>, vector<16x16xbf16>, vector<18x16xf32> -> vector<18x16xf32>
    %60 = arith.addf %56, %59 : vector<18x16xf32>
    %c6 = arith.constant 6 : index
    %c0_62 = arith.constant 0 : index
    %61 = vector.load %arg11[%c6, %c0_62] : memref<32x16xbf16, #tpu.memory_space<vmem>>, vector<18x16xbf16>
    %c32_63 = arith.constant 32 : index
    %c0_64 = arith.constant 0 : index
    %62 = vector.load %arg8[%c32_63, %c0_64] : memref<48x16xbf16, #tpu.memory_space<vmem>>, vector<16x16xbf16>
    %cst_65 = arith.constant dense<0.000000e+00> : vector<18x16xf32>
    %63 = tpu.matmul %61, %62, %cst_65 {dimension_numbers = #tpu.dot_dimension_numbers<[1], [0], [0], [1], [0, 0, 1, 1], [], []>} : vector<18x16xbf16>, vector<16x16xbf16>, vector<18x16xf32> -> vector<18x16xf32>
    %64 = arith.addf %60, %63 : vector<18x16xf32>
    %65 = vector.broadcast %53 : vector<1x16xf32> to vector<18x16xf32>
    %66 = arith.addf %64, %65 : vector<18x16xf32>
    %cst_66 = arith.constant 0.000000e+00 : f32
    %67 = vector.broadcast %cst_66 : f32 to vector<18x16xf32>
    %68 = arith.maximumf %66, %67 : vector<18x16xf32>
    %69 = arith.truncf %68 : vector<18x16xf32> to vector<18x16xbf16>
    %c0_67 = arith.constant 0 : index
    %c0_68 = arith.constant 0 : index
    %c0_69 = arith.constant 0 : index
    %70 = vector.load %arg10[%c0_67, %c0_68, %c0_69] : memref<1x24x16xbf16, #tpu.memory_space<vmem>>, vector<1x18x16xbf16>
    %71 = vector.shape_cast %70 : vector<1x18x16xbf16> to vector<18x16xbf16>
    %72 = vector.shape_cast %69 : vector<18x16xbf16> to vector<1x18x16xbf16>
    tpu.vector_store %arg10[%c0_67, %c0_68, %c0_69], %72 {strides = array<i32>} : memref<1x24x16xbf16, #tpu.memory_space<vmem>>, vector<1x18x16xbf16>,
    %cst_70 = arith.constant 0.000000e+00 : bf16
    %73 = vector.broadcast %cst_70 : bf16 to vector<6x16xbf16>
    %c0_71 = arith.constant 0 : index
    %c18 = arith.constant 18 : index
    %c0_72 = arith.constant 0 : index
    %74 = vector.load %arg10[%c0_71, %c18, %c0_72] : memref<1x24x16xbf16, #tpu.memory_space<vmem>>, vector<1x6x16xbf16>
    %75 = vector.shape_cast %74 : vector<1x6x16xbf16> to vector<6x16xbf16>
    %76 = vector.shape_cast %73 : vector<6x16xbf16> to vector<1x6x16xbf16>
    tpu.vector_store %arg10[%c0_71, %c18, %c0_72], %76 {strides = array<i32>} : memref<1x24x16xbf16, #tpu.memory_space<vmem>>, vector<1x6x16xbf16>,
    return
  }
  func.func @transform_0(%arg0: i32) -> (i32, i32, i32) {
    %c0_i32 = arith.constant 0 : i32
    %c0_i32_0 = arith.constant 0 : i32
    %c0_i32_1 = arith.constant 0 : i32
    return %arg0, %c0_i32, %c0_i32_0 : i32, i32, i32
  }
  func.func @transform_1(%arg0: i32) -> (i32, i32) {
    %c0_i32 = arith.constant 0 : i32
    %c0_i32_0 = arith.constant 0 : i32
    %c0_i32_1 = arith.constant 0 : i32
    return %c0_i32, %c0_i32_0 : i32, i32
  }
  func.func @transform_2(%arg0: i32) -> (i32, i32) {
    %c0_i32 = arith.constant 0 : i32
    %c0_i32_0 = arith.constant 0 : i32
    %c0_i32_1 = arith.constant 0 : i32
    return %c0_i32, %c0_i32_0 : i32, i32
  }
  func.func @transform_3(%arg0: i32) -> (i32, i32) {
    %c0_i32 = arith.constant 0 : i32
    %c0_i32_0 = arith.constant 0 : i32
    %c0_i32_1 = arith.constant 0 : i32
    return %c0_i32, %c0_i32_0 : i32, i32
  }
  func.func @transform_4(%arg0: i32) -> (i32, i32) {
    %c0_i32 = arith.constant 0 : i32
    %c0_i32_0 = arith.constant 0 : i32
    %c0_i32_1 = arith.constant 0 : i32
    return %c0_i32, %c0_i32_0 : i32, i32
  }
  func.func @transform_5(%arg0: i32) -> (i32, i32) {
    %c0_i32 = arith.constant 0 : i32
    %c0_i32_0 = arith.constant 0 : i32
    %c0_i32_1 = arith.constant 0 : i32
    return %c0_i32, %c0_i32_0 : i32, i32
  }
  func.func @transform_6(%arg0: i32) -> (i32, i32) {
    %c0_i32 = arith.constant 0 : i32
    %c0_i32_0 = arith.constant 0 : i32
    %c0_i32_1 = arith.constant 0 : i32
    return %c0_i32, %c0_i32_0 : i32, i32
  }
  func.func @transform_7(%arg0: i32) -> (i32, i32) {
    %c0_i32 = arith.constant 0 : i32
    %c0_i32_0 = arith.constant 0 : i32
    %c0_i32_1 = arith.constant 0 : i32
    return %c0_i32, %c0_i32_0 : i32, i32
  }
  func.func @transform_8(%arg0: i32) -> (i32, i32) {
    %c0_i32 = arith.constant 0 : i32
    %c0_i32_0 = arith.constant 0 : i32
    %c0_i32_1 = arith.constant 0 : i32
    return %c0_i32, %c0_i32_0 : i32, i32
  }
  func.func @transform_9(%arg0: i32) -> (i32, i32, i32) {
    %c0_i32 = arith.constant 0 : i32
    %c0_i32_0 = arith.constant 0 : i32
    %c0_i32_1 = arith.constant 0 : i32
    return %arg0, %c0_i32, %c0_i32_0 : i32, i32, i32
  }
}

</mosaic_0001>

<bundles_post_ra>
// kernel: tpu_custom_call.1
= control target key start
LH: loop header
LB: loop body
LE: loop exit
PB: predicated region body
PF: predicated region fallthrough
CT: control target
= control target key end

     0   :  { %s1629_s30 = smov 0   ;;  %s1738_s0 = inlined_call_operand.vmem [shape: bf16[2,32,32], index: 0, kind: input, shape index: {}]   ;;  %s1739_s1 = inlined_call_operand.vmem [shape: bf16[32,16], index: 1, kind: input, shape index: {}]   ;;  %s1740_s2 = inlined_call_operand.vmem [shape: f32[1,16], index: 2, kind: input, shape index: {}]   ;;  %s1741_s3 = inlined_call_operand.vmem [shape: bf16[80,16], index: 3, kind: input, shape index: {}]   ;;  %s1742_s4 = inlined_call_operand.vmem [shape: f32[1,16], index: 4, kind: input, shape index: {}]   ;;  %s1743_s5 = inlined_call_operand.vmem [shape: bf16[48,16], index: 5, kind: input, shape index: {}]   ;;  %s1744_s6 = inlined_call_operand.vmem [shape: f32[1,16], index: 6, kind: input, shape index: {}]   ;;  %s1745_s7 = inlined_call_operand.vmem [shape: bf16[48,16], index: 7, kind: input, shape index: {}]   ;;  %s1746_s8 = inlined_call_operand.vmem [shape: f32[1,16], index: 8, kind: input, shape index: {}]   ;;  %s1747_s9 = inlined_call_operand.vmem [shape: bf16[2,24,16], index: 9, kind: output, shape index: {}]  }
   0x1 LB: > { %s1358_s10 = sadd.s32 4294967295, %s1576_s30   ;;  %p1362_p0 = scmp.ge.s32.totalorder %s1576_s30, 1  ;;  %s1576_s30 = sphi %s1629_s30, %s19_s30  }
   0x2   : > { %p287_p1 = scmp.lt.s32.totalorder %s1576_s30, 3 }
   0x4   : > { %p288_p2 = pnand %p1362_p0, %p287_p1 }
   0x5   : > { %v1555_v0 = vld [vmem:[%s1739_s1] sm:$0xff] (!%p288_p2)   ;;  %p323_p3 = scmp.lt.s32.totalorder (!%p288_p2), %s1358_s10, 1  ;;  %v1556_v1 = vld [vmem:[%s1739_s1 + $0x8] sm:$0xff] (!%p288_p2)   ;;  %vm371_vm0 = vcmask (!%p288_p2), 261120   ;;  %vm1301_vm1 = vcmask (!%p288_p2), 125953   ;;  %v1578_v3 = vmov (!%p288_p2), 0  }
   0x6   : > { %291 = sbr.rel (%p288_p2) target bundleno = 1022 (0x3fe), region = 56  ;;  %1455 = vmatprep.subr.bf16.mxu0 (!%p288_p2), %v1555_v0  ;;  %v1559_v5 = vld [vmem:[%s1741_s3 + $0x8] sm:$0xff] (!%p288_p2)   ;;  %v1560_v6 = vld [vmem:[%s1741_s3] sm:$0xff] (!%p288_p2)   ;;  %vm429_vm2 = vcmask (!%p288_p2), 130048   ;;  %vm440_vm3 = vsmask.f32 (!%p288_p2), 7424 }
   0x7   : > { %1456 = vmatpush3.bf16.msra.mxu0 (!%p288_p2), %v1555_v0  ;;  %1463 = vmatprep.subr.bf16.mxu1 (!%p288_p2), %v1559_v5  ;;  %v1366_v8 = vld [vmem:[%s1740_s2] ss:$0 sm:$0xff] (!%p288_p2)  ;;  %v1561_v29 = vld [vmem:[%s1741_s3 + $0x10] sm:$0xff] (!%p288_p2)   ;;  %vm582_vm4 = vcmask (!%p288_p2), 1046528   ;;  %v1562_v34 = vld [vmem:[%s1741_s3 + $0x18] sm:$0xff] (!%p288_p2)   ;;  %vm742_vm6 = vcmask (!%p288_p2), 1045504  }
   0x8   : > { %1457 = vmatprep.subr.bf16.mxu0 (!%p288_p2), %v1556_v1  ;;  %1464 = vmatpush3.bf16.msra.mxu1 (!%p288_p2), %v1559_v5  ;;  %vm654_vm5 = vsmask.f32 (!%p288_p2), 6400  ;;  %v1563_v47 = vld [vmem:[%s1741_s3 + $0x20] sm:$0xff] (!%p288_p2)   ;;  %v1564_v53 = vld [vmem:[%s1743_s5 + $0x8] sm:$0xff] (!%p288_p2)   ;;  %vm828_vm7 = vcmask (!%p288_p2), 128000   ;;  %vm1051_vm8 = vcmask (!%p288_p2), 125952  }
   0x9   : > { %1469 = vmatprep.subr.bf16.mxu1 (!%p288_p2), %v1560_v6  ;;  %v1565_v54 = vld [vmem:[%s1743_s5] sm:$0xff] (!%p288_p2)   ;;  %vm1205_vm9 = vcmask (!%p288_p2), 1044480   ;;  %vm1299_vm10 = vcmask (!%p288_p2), 122880  }
   0xa   : > { %v1388_v55 = vld [vmem:[%s1742_s4] ss:$0 sm:$0xff] (!%p288_p2) }
   0xb   : > { %1458 = vmatpush3.bf16.msra.mxu0 (!%p288_p2), %v1556_v1 }
   0xc   : > { %1493 = vmatprep.subr.bf16.mxu0 (!%p288_p2), %v1564_v53 }
   0xd   : > { %s1749_s10 = smov (!%p323_p3, %s1358_s10), 1 }
   0xe   : > { %s1414_s15 = sshll.u32 %s1749_s10, 4  ;;  %s1545_s16 = smul.u32 12, %s1749_s10 }
   0xf   : > { %s327_s19 = scalar_lea.vmem %s1738_s0, %s1414_s15 }
  0x10   : > { %s1649_s22 = scalar_lea.vmem %s1747_s9, %s1545_s16  ;;  %v1557_v2 = vld [vmem:[%s327_s19] sm:$0xff]   ;;  %v1558_v4 = vld [vmem:[%s327_s19 + $0x8] sm:$0xff]  }
  0x11   : > { %1302 = vst.msk [vmem:[%s1649_s22 + $0x8] sm:$0xe] %vm1301_vm1, %v1578_v3  ;;  %1459 = vmatprep.mubr.msk.bf16.mxu0 %vm371_vm0, %v1557_v2 }
  0x12   : > { %1460 = vmatmul.mubr.msk.bf16.vlgmr.msra.gmra.mrb[0].mxu0 %vm371_vm0, %v1558_v4 }
  0x13   : > { %1494 = vmatpush3.bf16.msra.mxu0 %v1564_v53 }
  0x14   : > { %1499 = vmatprep.subr.bf16.mxu0 %v1565_v54 }
  0xe5   : > { %v1461_v7 = vpop.f32.mrb[0].mxu0 }
  0xe6   : > { %v412_v9 = vpop.f32.mrb[1].mxu0  ;;  %v421_v11 = vadd.f32 %v1461_v7, %v1366_v8 }
  0xe7   : > { %v1462_v10 = vpop.f32.mrb[2].mxu0  ;;  %v413_v14 = vadd.f32 %v1366_v8, %v412_v9 }
  0xe8   : > { %v424_v12 = vadd.f32 %v1462_v10, %v1366_v8  ;;  %v415_v13 = vpop.f32.mrb[3].mxu0 }
  0xe9   : > { %v416_v15 = vadd.f32 %v1366_v8, %v415_v13 }
  0xea   : > { %v428_v16 = vpack.c.bf16 %v424_v12, %v421_v11  ;;  %v1566_v11 = vld [vmem:[%s1743_s5 + $0x10] sm:$0xff]  }
  0xeb   : > { %v427_v17 = vpack.c.bf16 %v416_v15, %v413_v14 }
  0xec   : > { %431 = vst.msk [vmem:[#allocation2 + $0x8] sm:$0xff] %vm429_vm2, %v428_v16 }
  0xed   : > { %430 = vst.msk [vmem:[#allocation2] sm:$0xff] %vm429_vm2, %v427_v17 }
  0xf3   : > { %v437_v18 = vld [vmem:[#allocation2 + $0x8] sm:$0x7f] }
  0xf4   : > { %v433_v19 = vld [vmem:[#allocation2] sm:$0xff]  ;;  %v449_v20 = vshll.u32 %v437_v18, 16  ;;  %v453_v26 = vshrl.u32 %v437_v18, 16  ;;  %v584_v32 = vrot.slane %v437_v18, 1  ;;  %v651_v33 = vld [vmem:[#allocation2 + $0x8] sm:$0xff] }
  0xf5   : > { %v444_v21 = vshll.u32 %v433_v19, 16  ;;  %v442_v22 = vshrl.u32 %v433_v19, 16  ;;  %v577_v30 = vld [vmem:[#allocation2] sm:$0xfe]  ;;  %v434_v35 = vld [vmem:[#allocation2 + $0x8] sm:$0x3f] }
  0xf6   : > { %v451_v24 = vrot.slane %v449_v20, 1  ;;  %v583_v31 = vrot.slane %v577_v30, 1  ;;  %v656_v36 = vshrl.u32 %v577_v30, 16  ;;  %v659_v38 = vshll.u32 %v577_v30, 16  ;;  %v737_v49 = vld [vmem:[#allocation2] sm:$0xfc] }
  0xf7   : > { %v446_v23 = vrot.slane %v444_v21, 1  ;;  %v664_v39 = vshrl.u32 %v651_v33, 16  ;;  %v667_v40 = vshll.u32 %v651_v33, 16  ;;  %v743_v50 = vrot.slane %v737_v49, 2  ;;  %v1568_v20 = vld [vmem:[%s1745_s7 + $0x8] sm:$0xff]   ;;  %v1569_v21 = vld [vmem:[%s1745_s7 + $0x10] sm:$0xff]  }
  0xf8   : > { %v455_v28 = vor.u32 %v453_v26, %v451_v24  ;;  %v585_v37 = vsel %vm582_vm4, %v583_v31, %v584_v32  ;;  %v658_v41 = vrot.slane %v656_v36, 1  ;;  %v661_v42 = vrot.slane %v659_v38, 2 }
  0xf9   : > { %v447_v25 = vor.u32 %v446_v23, %v442_v22  ;;  %v666_v43 = vrot.slane %v664_v39, 1  ;;  %v669_v44 = vrot.slane %v667_v40, 2  ;;  %v744_v51 = vrot.slane %v651_v33, 2  ;;  %v1398_v33 = vld [vmem:[%s1744_s6] ss:$0 sm:$0xff] }
  0xfa   : > { %v662_v45 = vor.u32 %v661_v42, %v658_v41 }
  0xfb   : > { %v452_v27 = vsel %vm440_vm3, %v447_v25, %v451_v24  ;;  %v670_v46 = vor.u32 %v669_v44, %v666_v43  ;;  %v745_v52 = vsel %vm742_vm6, %v743_v50, %v744_v51 }
  0xfc   : > { %1465 = vmatprep.mubr.msk.bf16.mxu1 %vm429_vm2, %v452_v27 }
  0xfd   : > { %1466 = vmatmul.mubr.msk.bf16.vlgmr.msra.gmra.mrb[0].mxu1 %vm429_vm2, %v455_v28  ;;  %v671_v48 = vsel %vm654_vm5, %v662_v45, %v670_v46 }
  0xfe   : > { %1470 = vmatpush3.bf16.msra.mxu1 %v1560_v6  ;;  %1471 = vmatprep.mubr.msk.bf16.mxu1 %vm429_vm2, %v433_v19  ;;  %v1567_v19 = vld [vmem:[%s1745_s7] sm:$0xff]  }
  0xff   : > { %1475 = vmatprep.subr.bf16.mxu1 %v1561_v29 }
 0x109   : > { %1472 = vmatmul.mubr.msk.bf16.vlgmr.msra.gmra.mrb[0].mxu1 %vm429_vm2, %v434_v35 }
 0x10a   : > { %1476 = vmatpush3.bf16.msra.mxu1 %v1561_v29  ;;  %1477 = vmatprep.mubr.msk.bf16.mxu1 %vm429_vm2, %v585_v37 }
 0x10b   : > { %1481 = vmatprep.subr.bf16.mxu1 %v1562_v34 }
 0x115   : > { %1478 = vmatmul.mubr.msk.bf16.vlgmr.msra.gmra.mrb[0].mxu1 %vm429_vm2, %v584_v32 }
 0x116   : > { %1482 = vmatpush3.bf16.msra.mxu1 %v1562_v34  ;;  %1483 = vmatprep.mubr.msk.bf16.mxu1 %vm429_vm2, %v671_v48 }
 0x117   : > { %1487 = vmatprep.subr.bf16.mxu1 %v1563_v47 }
 0x121   : > { %1484 = vmatmul.mubr.msk.bf16.vlgmr.msra.gmra.mrb[0].mxu1 %vm429_vm2, %v670_v46 }
 0x122   : > { %1488 = vmatpush3.bf16.msra.mxu1 %v1563_v47  ;;  %1489 = vmatprep.mubr.msk.bf16.mxu1 %vm429_vm2, %v745_v52 }
 0x123   : > { %1517 = vmatprep.subr.bf16.mxu1 %v1567_v19 }
 0x12d   : > { %1490 = vmatmul.mubr.msk.bf16.vlgmr.msra.gmra.mrb[0].mxu1 %vm429_vm2, %v744_v51 }
 0x12e   : > { %1518 = vmatpush3.bf16.msra.mxu1 %v1567_v19 }
 0x200   : > { %v1491_v56 = vpop.f32.mrb[0].mxu1 }
 0x201   : > { %v819_v57 = vadd.f32 %v1491_v56, %v1388_v55  ;;  %v792_v58 = vpop.f32.mrb[1].mxu1 }
 0x202   : > { %v817_v59 = vadd.f32 %v1388_v55, %v792_v58  ;;  %v1492_v60 = vpop.f32.mrb[2].mxu1 }
 0x203   : > { %v820_v61 = vadd.f32 %v1492_v60, %v1388_v55  ;;  %v795_v62 = vpop.f32.mrb[3].mxu1  ;;  %v823_v0 = vmax.f32 %v819_v57, 0.0 }
 0x204   : > { %v818_v63 = vadd.f32 %v1388_v55, %v795_v62  ;;  %v821_v2 = vmax.f32 %v817_v59, 0.0 }
 0x205   : > { %v824_v1 = vmax.f32 %v820_v61, 0.0 }
 0x206   : > { %v822_v3 = vmax.f32 %v818_v63, 0.0 }
 0x207   : > { %v826_v4 = vpack.c.bf16 %v824_v1, %v823_v0 }
 0x208   : > { %v825_v5 = vpack.c.bf16 %v822_v3, %v821_v2 }
 0x209   : > { %829 = vst.msk [vmem:[#allocation3 + $0x8] sm:$0x3f] %vm828_vm7, %v826_v4 }
 0x20a   : > { %827 = vst.msk [vmem:[#allocation3] sm:$0xff] %vm429_vm2, %v825_v5 }
 0x210   : > { %v836_v6 = vld [vmem:[#allocation3 + $0x8] sm:$0x1f] }
 0x211   : > { %v835_v7 = vld [vmem:[#allocation3] sm:$0xfe]  ;;  %v842_v8 = vrot.slane %v836_v6, 1  ;;  %v965_v14 = vld [vmem:[#allocation3 + $0x8] sm:$0x3f] }
 0x212   : > { %v841_v9 = vrot.slane %v835_v7, 1  ;;  %v831_v12 = vld [vmem:[#allocation3] sm:$0xff]  ;;  %v971_v16 = vrot.slane %v965_v14, 2  ;;  %v832_v17 = vld [vmem:[#allocation3 + $0x8] sm:$0xf] }
 0x213   : > { %v964_v13 = vld [vmem:[#allocation3] sm:$0xfc] }
 0x214   : > { %v843_v10 = vsel %vm582_vm4, %v841_v9, %v842_v8  ;;  %v970_v15 = vrot.slane %v964_v13, 2 }
 0x215   : > { %1495 = vmatprep.mubr.msk.bf16.mxu0 %vm429_vm2, %v843_v10 }
 0x216   : > { %1496 = vmatmul.mubr.msk.bf16.vlgmr.msra.gmra.mrb[4].mxu0 %vm429_vm2, %v842_v8  ;;  %v972_v18 = vsel %vm742_vm6, %v970_v15, %v971_v16 }
 0x217   : > { %1500 = vmatpush3.bf16.msra.mxu0 %v1565_v54  ;;  %1501 = vmatprep.mubr.msk.bf16.mxu0 %vm429_vm2, %v831_v12 }
 0x218   : > { %1505 = vmatprep.subr.bf16.mxu0 %v1566_v11 }
 0x21e   : > { %1502 = vmatmul.mubr.msk.bf16.vlgmr.msra.gmra.mrb[8].mxu0 %vm429_vm2, %v832_v17 }
 0x21f   : > { %1506 = vmatpush3.bf16.msra.mxu0 %v1566_v11  ;;  %1507 = vmatprep.mubr.msk.bf16.mxu0 %vm429_vm2, %v972_v18 }
 0x220   : > { %1511 = vmatprep.subr.bf16.mxu0 %v1568_v20 }
 0x226   : > { %1508 = vmatmul.mubr.msk.bf16.vlgmr.msra.gmra.mrb[12].mxu0 %vm429_vm2, %v971_v16  ;;  %v1408_v16 = vld [vmem:[%s1746_s8] ss:$0 sm:$0xff] }
 0x227   : > { %1512 = vmatpush3.bf16.msra.mxu0 %v1568_v20 }
 0x228   : > { %1523 = vmatprep.subr.bf16.mxu0 %v1569_v21 }
 0x2e9   : > { %v1497_v22 = vpop.f32.mrb[4].mxu0 }
 0x2ea   : > { %v890_v23 = vpop.f32.mrb[5].mxu0 }
 0x2eb   : > { %v1498_v24 = vpop.f32.mrb[6].mxu0 }
 0x2ec   : > { %v893_v25 = vpop.f32.mrb[7].mxu0 }
 0x2f1   : > { %v1503_v26 = vpop.f32.mrb[8].mxu0 }
 0x2f2   : > { %v959_v27 = vadd.f32 %v1503_v26, %v1497_v22  ;;  %v950_v28 = vpop.f32.mrb[9].mxu0 }
 0x2f3   : > { %v951_v29 = vadd.f32 %v950_v28, %v890_v23  ;;  %v1504_v30 = vpop.f32.mrb[10].mxu0 }
 0x2f4   : > { %v953_v31 = vpop.f32.mrb[11].mxu0 }
 0x2f5   : > { %v954_v32 = vadd.f32 %v953_v31, %v893_v25 }
 0x2f9   : > { %v1509_v34 = vpop.f32.mrb[12].mxu0 }
 0x2fa   : > { %v1035_v35 = vadd.f32 %v1509_v34, %v959_v27  ;;  %v1019_v36 = vpop.f32.mrb[13].mxu0 }
 0x2fb   : > { %v1033_v37 = vadd.f32 %v1019_v36, %v951_v29  ;;  %v1510_v38 = vpop.f32.mrb[14].mxu0 }
 0x2fc   : > { %v1044_v39 = vadd.f32 %v1398_v33, %v1035_v35  ;;  %v1022_v40 = vpop.f32.mrb[15].mxu0 }
 0x2fd   : > { %v1042_v41 = vadd.f32 %v1398_v33, %v1033_v37  ;;  %v1034_v42 = vadd.f32 %v1022_v40, %v954_v32 }
 0x2fe   : > { %v1047_v43 = vmax.f32 %v1044_v39, 0.0 }
 0x2ff   : > { %v1043_v44 = vadd.f32 %v1398_v33, %v1034_v42  ;;  %v1045_v46 = vmax.f32 %v1042_v41, 0.0 }
 0x300   : > { %v1049_v45 = vpack.c.bf16 %v1047_v43, %v1047_v43 }
 0x301   : > { %v1046_v47 = vmax.f32 %v1043_v44, 0.0 }
 0x302   : > { %1052 = vst.msk [vmem:[#allocation2 + $0x8] sm:$0xf] %vm1051_vm8, %v1049_v45 }
 0x303   : > { %v1048_v48 = vpack.c.bf16 %v1046_v47, %v1045_v46 }
 0x305   : > { %1050 = vst.msk [vmem:[#allocation2] sm:$0xff] %vm429_vm2, %v1048_v48 }
 0x309   : > { %v1059_v49 = vld [vmem:[#allocation2 + $0x8] sm:$0x7] }
 0x30a   : > { %v1071_v50 = vshrl.u32 %v1059_v49, 16  ;;  %v1074_v51 = vshll.u32 %v1059_v49, 16  ;;  %v1055_v54 = vld [vmem:[#allocation2 + $0x8] sm:$0x1] }
 0x30b   : > { %v1200_v62 = vld [vmem:[#allocation2 + $0x8] sm:$0xf] }
 0x30c   : > { %v1054_v52 = vld [vmem:[#allocation2] sm:$0xff]  ;;  %v1073_v57 = vrot.slane %v1071_v50, 1  ;;  %v1076_v58 = vrot.slane %v1074_v51, 2  ;;  %v1207_v3 = vrot.slane %v1200_v62, 3 }
 0x30d   : > { %v1058_v53 = vld [vmem:[#allocation2] sm:$0xfe]  ;;  %1519 = vmatprep.mubr.msk.bf16.mxu1 %vm429_vm2, %v1054_v52 }
 0x30e   : > { %v1063_v55 = vshrl.u32 %v1058_v53, 16  ;;  %v1066_v56 = vshll.u32 %v1058_v53, 16  ;;  %1520 = vmatmul.mubr.msk.bf16.vlgmr.msra.gmra.mrb[4].mxu1 %vm429_vm2, %v1055_v54  ;;  %v1199_v59 = vld [vmem:[#allocation2] sm:$0xf8]  ;;  %v1077_v0 = vor.u32 %v1076_v58, %v1073_v57 }
 0x30f   : > { %v1206_v1 = vrot.slane %v1199_v59, 3 }
 0x310   : > { %v1065_v60 = vrot.slane %v1063_v55, 1  ;;  %v1068_v61 = vrot.slane %v1066_v56, 2 }
 0x311   : > { %v1208_v4 = vsel %vm1205_vm9, %v1206_v1, %v1207_v3 }
 0x312   : > { %v1069_v63 = vor.u32 %v1068_v61, %v1065_v60 }
 0x314   : > { %v1078_v2 = vsel %vm654_vm5, %v1069_v63, %v1077_v0 }
 0x315   : > { %1513 = vmatprep.mubr.msk.bf16.mxu0 %vm429_vm2, %v1078_v2 }
 0x316   : > { %1514 = vmatmul.mubr.msk.bf16.vlgmr.msra.gmra.mrb[16].mxu0 %vm429_vm2, %v1077_v0 }
 0x317   : > { %1524 = vmatpush3.bf16.msra.mxu0 %v1569_v21  ;;  %1525 = vmatprep.mubr.msk.bf16.mxu0 %vm429_vm2, %v1208_v4 }
 0x31e   : > { %1526 = vmatmul.mubr.msk.bf16.vlgmr.msra.gmra.mrb[20].mxu0 %vm429_vm2, %v1207_v3 }
 0x3e1   : > { %v1521_v5 = vpop.f32.mrb[4].mxu1 }
 0x3e2   : > { %v1185_v6 = vpop.f32.mrb[5].mxu1 }
 0x3e3   : > { %v1522_v7 = vpop.f32.mrb[6].mxu1 }
 0x3e4   : > { %v1188_v8 = vpop.f32.mrb[7].mxu1 }
 0x3e9   : > { %v1515_v9 = vpop.f32.mrb[16].mxu0 }
 0x3ea   : > { %v1194_v10 = vadd.f32 %v1521_v5, %v1515_v9  ;;  %v1125_v11 = vpop.f32.mrb[17].mxu0 }
 0x3eb   : > { %v1186_v12 = vadd.f32 %v1185_v6, %v1125_v11  ;;  %v1516_v13 = vpop.f32.mrb[18].mxu0 }
 0x3ec   : > { %v1128_v14 = vpop.f32.mrb[19].mxu0 }
 0x3ed   : > { %v1189_v15 = vadd.f32 %v1188_v8, %v1128_v14 }
 0x3f1   : > { %v1527_v17 = vpop.f32.mrb[20].mxu0 }
 0x3f2   : > { %v1271_v18 = vadd.f32 %v1527_v17, %v1194_v10  ;;  %v1255_v19 = vpop.f32.mrb[21].mxu0 }
 0x3f3   : > { %v1269_v20 = vadd.f32 %v1255_v19, %v1186_v12  ;;  %v1528_v21 = vpop.f32.mrb[22].mxu0 }
 0x3f4   : > { %v1280_v22 = vadd.f32 %v1408_v16, %v1271_v18  ;;  %v1258_v23 = vpop.f32.mrb[23].mxu0 }
 0x3f5   : > { %v1278_v24 = vadd.f32 %v1408_v16, %v1269_v20  ;;  %v1270_v25 = vadd.f32 %v1258_v23, %v1189_v15 }
 0x3f6   : > { %v1283_v26 = vmax.f32 %v1280_v22, 0.0 }
 0x3f7   : > { %v1281_v27 = vmax.f32 %v1278_v24, 0.0  ;;  %v1279_v28 = vadd.f32 %v1408_v16, %v1270_v25 }
 0x3f8   : > { %v1417_v29 = vpack.c.bf16 %v1283_v26, %v1283_v26 }
 0x3f9   : > { %v1415_v30 = vpack.c.bf16 %v1281_v27, %v1281_v27  ;;  %v1282_v31 = vmax.f32 %v1279_v28, 0.0 }
 0x3fa   : > { %1300 = vst.msk [vmem:[%s1649_s22 + $0x8] sm:$0x1] %vm1299_vm10, %v1417_v29 }
 0x3fb   : > { %1297 = vst.msk [vmem:[%s1649_s22] sm:$0xf] %vm1051_vm8, %v1415_v30  ;;  %v1416_v32 = vpack.c.bf16 %v1282_v31, %v1282_v31 }
 0x3fd   : > { %1298 = vst.msk [vmem:[%s1649_s22 + $0x4] sm:$0xf] %vm1051_vm8, %v1416_v32 }
 0x3fe PF: > { %s19_s30 = sadd.s32 1, %s1576_s30  }
 0x3ff   : > { %p16_p4 = scmp.ge.s32.totalorder %s19_s30, 4  }
 0x401   :  { %18 = sbr.rel (!%p16_p4) target bundleno = 1 (0x1), region = 86 }

</bundles_post_ra>
